<compile_context>
chip_gen: v7x
topology: tpu7x:2x2x1
jax: 0.10.0
libtpu: 0.0.40
codegen_flags: <defaults>
</compile_context>

<pallas_src>
import math
import functools
from typing import NamedTuple

import jax
import jax.numpy as jnp
from jax import lax
from jax.experimental import pallas as pl
from jax.experimental.pallas import tpu as pltpu


# ----------------------------- Pallas kernels ------------------------------

def _noisy_linear_train_kernel(x_ref, wmu_ref, wsig_ref, vout_ref, vin_ref,
                               bmu_ref, bsig_ref, beps_ref, o_ref,
                               acc_ref=None, *, single_k):
    # Rebuild the factorized-noise tile on the VPU (f32): eps = v_out (x) v_in.
    eps = vout_ref[...] * vin_ref[...]                           # (tn, tk) f32
    # Effective (noisy) weight tile, fused in f32, cast to the MXU dtype.
    w = (eps * wsig_ref[...].astype(jnp.float32)
         + wmu_ref[...].astype(jnp.float32)).astype(x_ref.dtype)

    # x (tm, tk) contracted with w (tn, tk) on their last dims -> (tm, tn);
    # no in-kernel transpose / XLU relayout.
    part = lax.dot_general(x_ref[...], w,
                           dimension_numbers=(((1,), (1,)), ((), ())),
                           preferred_element_type=jnp.float32)

    if single_k:
        # Fast path: in_size fits a single K tile -> no accumulator round trip.
        b = beps_ref[...] * bsig_ref[...] + bmu_ref[...]         # (1, tn) f32
        o_ref[...] = (part + b).astype(o_ref.dtype)
    else:
        k = pl.program_id(2)

        @pl.when(k == 0)
        def _():
            acc_ref[...] = jnp.zeros_like(acc_ref)

        acc_ref[...] += part

        @pl.when(k == pl.num_programs(2) - 1)
        def _():
            b = beps_ref[...] * bsig_ref[...] + bmu_ref[...]
            o_ref[...] = (acc_ref[...] + b).astype(o_ref.dtype)


def _noisy_linear_eval_kernel(x_ref, wmu_ref, bmu_ref, o_ref,
                              acc_ref=None, *, single_k):
    part = lax.dot_general(x_ref[...], wmu_ref[...],
                           dimension_numbers=(((1,), (1,)), ((), ())),
                           preferred_element_type=jnp.float32)
    if single_k:
        o_ref[...] = (part + bmu_ref[...]).astype(o_ref.dtype)
    else:
        k = pl.program_id(2)

        @pl.when(k == 0)
        def _():
            acc_ref[...] = jnp.zeros_like(acc_ref)

        acc_ref[...] += part

        @pl.when(k == pl.num_programs(2) - 1)
        def _():
            o_ref[...] = (acc_ref[...] + bmu_ref[...]).astype(o_ref.dtype)


# ------------------------------ tiling helpers ------------------------------

def _round_up(x, m):
    return (x + m - 1) // m * m


def _pick_kn_tiles(k, n):
    # Lane-aligned (multiple-of-128) K/N tiles. Bigger blocks amortize the
    # per-grid-step overhead and reach a higher fraction of HBM roofline.
    if k >= 1024:
        tk = 1024
    elif k >= 512:
        tk = 512
    elif k >= 256:
        tk = 256
    else:
        tk = 128
    if n >= 512:
        tn = 512
    elif n >= 256:
        tn = 256
    else:
        tn = 128
    return tk, tn


def _pick_m_tile(b):
    # Larger tm for big batches cuts weight re-streaming (weights are re-read
    # from HBM once per M tile); sublane-aligned tm for small batches.
    if b >= 512:
        return 512
    if b >= 256:
        return 256
    if b >= 128:
        return 128
    return _round_up(b, 8)


class NoisyLinearSpec(NamedTuple):
    in_size: int
    out_size: int
    tk: int
    tn: int


# --------------------------- parameter preparation --------------------------

def prepare_noisy_linear(params, compute_dtype=jnp.bfloat16):
    """Pad & cast the (batch-independent) parameters ONCE.

    Hoisting padding out of the per-call forward removes a weight-sized HBM
    round trip per call; casting weights to bf16 halves weight HBM traffic
    (the fuse and the accumulator remain f32 inside the kernel).
    """
    out_size, in_size = params["weight_mu"].shape
    tk, tn = _pick_kn_tiles(in_size, out_size)
    Kp = _round_up(in_size, tk)
    Np = _round_up(out_size, tn)

    def pad_w(w):
        if w.shape != (Np, Kp):
            w = jnp.pad(w, ((0, Np - out_size), (0, Kp - in_size)))
        return w.astype(compute_dtype)

    def pad_row(v):                              # (out,) -> (1, Np) float32
        v = v.reshape(1, out_size).astype(jnp.float32)
        if Np != out_size:
            v = jnp.pad(v, ((0, 0), (0, Np - out_size)))
        return v

    v_in = params["weight_eps_in"].reshape(1, in_size).astype(jnp.float32)
    if Kp != in_size:
        v_in = jnp.pad(v_in, ((0, 0), (0, Kp - in_size)))
    v_out = params["weight_eps_out"].reshape(out_size, 1).astype(jnp.float32)
    if Np != out_size:
        v_out = jnp.pad(v_out, ((0, Np - out_size), (0, 0)))

    prepared = {
        "weight_mu": pad_w(params["weight_mu"]),        # (Np, Kp) compute dt
        "weight_sigma": pad_w(params["weight_sigma"]),  # (Np, Kp) compute dt
        "eps_out": v_out,                                # (Np, 1)  f32
        "eps_in": v_in,                                  # (1, Kp)  f32
        "bias_mu": pad_row(params["bias_mu"]),           # (1, Np)  f32
        "bias_sigma": pad_row(params["bias_sigma"]),     # (1, Np)  f32
        "bias_eps": pad_row(params["bias_eps"]),         # (1, Np)  f32
    }
    return prepared, NoisyLinearSpec(in_size, out_size, tk, tn)


# ------------------------------ JAX forward ---------------------------------

@functools.partial(jax.jit, static_argnames=("spec", "training"))
def noisy_linear_forward(x, prepared, spec, training=True):
    """Forward pass of NoisyLinear (x: (B, in_size))."""
    B, in_size = x.shape
    assert in_size == spec.in_size
    out_size = spec.out_size
    tk, tn = spec.tk, spec.tn
    Np, Kp = prepared["weight_mu"].shape
    compute_dtype = prepared["weight_mu"].dtype

    tm = _pick_m_tile(B)
    Bp = _round_up(B, tm)

    # v7x megacore: guarantee >= 2 parallel (i, j) grid points so both
    # TensorCores get work. Prefer splitting N (weight rows are disjoint, so
    # no extra weight re-streaming).
    if (Bp // tm) * (Np // tn) == 1:
        if tn >= 256:
            tn //= 2
        elif tm >= 16 and tm % 16 == 0:
            tm //= 2
            Bp = _round_up(B, tm)

    grid = (Bp // tm, Np // tn, Kp // tk)
    single_k = grid[2] == 1

    # Zero-pad x to tile-aligned shape (zeros contribute nothing to the dot)
    # and cast to the compute dtype; padded rows/cols are sliced off below.
    xp = x
    if (Bp, Kp) != x.shape:
        xp = jnp.pad(xp, ((0, Bp - B), (0, Kp - in_size)))
    xp = xp.astype(compute_dtype)

    x_spec = pl.BlockSpec((tm, tk), lambda i, j, k: (i, k))
    w_spec = pl.BlockSpec((tn, tk), lambda i, j, k: (j, k))
    vout_spec = pl.BlockSpec((tn, 1), lambda i, j, k: (j, 0))
    vin_spec = pl.BlockSpec((1, tk), lambda i, j, k: (0, k))
    b_spec = pl.BlockSpec((1, tn), lambda i, j, k: (0, j))
    o_spec = pl.BlockSpec((tm, tn), lambda i, j, k: (i, j))   # lane-dense out

    out_shape = jax.ShapeDtypeStruct((Bp, Np), x.dtype)
    scratch = [] if single_k else [pltpu.VMEM((tm, tn), jnp.float32)]
    cparams = pltpu.CompilerParams(
        dimension_semantics=("parallel", "parallel", "arbitrary"),
        vmem_limit_bytes=32 * 1024 * 1024)

    w_item = compute_dtype.itemsize
    n_weight_streams = 2 if training else 1
    cost = pl.CostEstimate(
        flops=2 * Bp * Kp * Np + (3 * Kp * Np if training else 0),
        transcendentals=0,
        bytes_accessed=(Bp * Kp * w_item
                        + n_weight_streams * Np * Kp * w_item * (Bp // tm)
                        + Bp * Np * x.dtype.itemsize))

    if training:
        kernel = functools.partial(_noisy_linear_train_kernel,
                                   single_k=single_k)
        in_specs = [x_spec, w_spec, w_spec, vout_spec, vin_spec,
                    b_spec, b_spec, b_spec]
        args = (xp, prepared["weight_mu"], prepared["weight_sigma"],
                prepared["eps_out"], prepared["eps_in"],
                prepared["bias_mu"], prepared["bias_sigma"],
                prepared["bias_eps"])
    else:
        kernel = functools.partial(_noisy_linear_eval_kernel,
                                   single_k=single_k)
        in_specs = [x_spec, w_spec, b_spec]
        args = (xp, prepared["weight_mu"], prepared["bias_mu"])

    out = pl.pallas_call(
        kernel,
        out_shape=out_shape,
        grid_spec=pltpu.PrefetchScalarGridSpec(
            num_scalar_prefetch=0,
            grid=grid,
            in_specs=in_specs,
            out_specs=o_spec,
            scratch_shapes=scratch),
        compiler_params=cparams,
        cost_estimate=cost,
    )(*args)

    return out[:B, :out_size]


# ------------------------- deterministic param init -------------------------

def _scale_noise(key, size):
    # t.sign() * sqrt(|t|), t ~ N(0, 1)   (matches NoisyLinear._scale_noise)
    t = jax.random.normal(key, (size,), dtype=jnp.float32)
    return jnp.sign(t) * jnp.sqrt(jnp.abs(t))


def init_noisy_linear(key, in_size, out_size, std_init=0.5):
    k_wmu, k_bmu, k_vin, k_vout = jax.random.split(key, 4)
    mu_range = 1.0 / math.sqrt(in_size)

    weight_mu = jax.random.uniform(
        k_wmu, (out_size, in_size), minval=-mu_range, maxval=mu_range,
        dtype=jnp.float32)
    weight_sigma = jnp.full((out_size, in_size),
                            std_init / math.sqrt(in_size), dtype=jnp.float32)
    bias_mu = jax.random.uniform(
        k_bmu, (out_size,), minval=-mu_range, maxval=mu_range,
        dtype=jnp.float32)
    bias_sigma = jnp.full((out_size,),
                          std_init / math.sqrt(out_size), dtype=jnp.float32)

    # Factorized Gaussian noise (reset_noise):
    #   weight_eps = outer(v_out, v_in), bias_eps = v_out.
    # Only the factors are stored; the kernel rebuilds eps tiles on-chip
    # instead of streaming a weight-sized tensor from HBM.
    v_in = _scale_noise(k_vin, in_size)
    v_out = _scale_noise(k_vout, out_size)

    return {
        "weight_mu": weight_mu,
        "weight_sigma": weight_sigma,
        "weight_eps_in": v_in,
        "weight_eps_out": v_out,
        "bias_mu": bias_mu,
        "bias_sigma": bias_sigma,
        "bias_eps": v_out,
    }


# ---------------------------------- main -------------------------------------

if __name__ == "__main__":
    key = jax.random.PRNGKey(0)
    k_params, k_x = jax.random.split(key)

    in_size, out_size, batch = 32, 16, 8
    params = init_noisy_linear(k_params, in_size, out_size, std_init=0.5)
    x = jax.random.normal(k_x, (batch, in_size), dtype=jnp.float32)

    # Plain-JAX f32 reference, matching the torch forward exactly.
    weight_eps = jnp.outer(params["weight_eps_out"], params["weight_eps_in"])
    w_eff = weight_eps * params["weight_sigma"] + params["weight_mu"]
    b_eff = params["bias_eps"] * params["bias_sigma"] + params["bias_mu"]
    ref_train = x @ w_eff.T + b_eff
    ref_eval = x @ params["weight_mu"].T + params["bias_mu"]

    # ---- bf16 compute path (default: halves HBM weight traffic) ----
    prep_bf16, spec = prepare_noisy_linear(params, compute_dtype=jnp.bfloat16)
    y_train = jax.block_until_ready(
        noisy_linear_forward(x, prep_bf16, spec=spec, training=True))
    y_eval = jax.block_until_ready(
        noisy_linear_forward(x, prep_bf16, spec=spec, training=False))

    assert y_train.shape == (batch, out_size)
    assert y_eval.shape == (batch, out_size)
    assert jnp.allclose(y_train, ref_train, atol=5e-2, rtol=5e-2)
    assert jnp.allclose(y_eval, ref_eval, atol=5e-2, rtol=5e-2)

    # ---- f32 compute path (reference-faithful check) ----
    prep_f32, spec32 = prepare_noisy_linear(params, compute_dtype=jnp.float32)
    y_train32 = jax.block_until_ready(
        noisy_linear_forward(x, prep_f32, spec=spec32, training=True))
    y_eval32 = jax.block_until_ready(
        noisy_linear_forward(x, prep_f32, spec=spec32, training=False))

    assert jnp.allclose(y_train32, ref_train, atol=1e-4, rtol=1e-4)
    assert jnp.allclose(y_eval32, ref_eval, atol=1e-4, rtol=1e-4)

    print("KERNEL_OK")
</pallas_src>

<mosaic_0001>
module attributes {stable_mosaic.version = 11 : i64} {
  func.func @_noisy_linear_train_kernel(%arg0: i32, %arg1: i32, %arg2: i32, %arg3: memref<8x128xbf16, #tpu.memory_space<vmem>>, %arg4: memref<128x128xbf16, #tpu.memory_space<vmem>>, %arg5: memref<128x128xbf16, #tpu.memory_space<vmem>>, %arg6: memref<128x1xf32, #tpu.memory_space<vmem>>, %arg7: memref<1x128xf32, #tpu.memory_space<vmem>>, %arg8: memref<1x128xf32, #tpu.memory_space<vmem>>, %arg9: memref<1x128xf32, #tpu.memory_space<vmem>>, %arg10: memref<1x128xf32, #tpu.memory_space<vmem>>, %arg11: memref<8x128xf32, #tpu.memory_space<vmem>>) attributes {dimension_semantics = [#tpu.dimension_semantics<parallel>, #tpu.dimension_semantics<parallel>, #tpu.dimension_semantics<arbitrary>], iteration_bounds = array<i64: 1, 1, 1>, scalar_prefetch = 0 : i64, scratch_operands = 0 : i64, tpu.core_type = #tpu.core_type<tc>, window_params = [{transform_indices = @transform_0, window_bounds = array<i64: 8, 128>}, {transform_indices = @transform_1, window_bounds = array<i64: 128, 128>}, {transform_indices = @transform_2, window_bounds = array<i64: 128, 128>}, {transform_indices = @transform_3, window_bounds = array<i64: 128, 1>}, {transform_indices = @transform_4, window_bounds = array<i64: 1, 128>}, {transform_indices = @transform_5, window_bounds = array<i64: 1, 128>}, {transform_indices = @transform_6, window_bounds = array<i64: 1, 128>}, {transform_indices = @transform_7, window_bounds = array<i64: 1, 128>}, {transform_indices = @transform_8, window_bounds = array<i64: 8, 128>}]} {
    %c0 = arith.constant 0 : index
    %c0_0 = arith.constant 0 : index
    %0 = vector.load %arg6[%c0, %c0_0] : memref<128x1xf32, #tpu.memory_space<vmem>>, vector<128x1xf32>
    %c0_1 = arith.constant 0 : index
    %c0_2 = arith.constant 0 : index
    %1 = vector.load %arg7[%c0_1, %c0_2] : memref<1x128xf32, #tpu.memory_space<vmem>>, vector<1x128xf32>
    %2 = vector.broadcast %0 : vector<128x1xf32> to vector<128x128xf32>
    %3 = vector.broadcast %1 : vector<1x128xf32> to vector<128x128xf32>
    %4 = arith.mulf %2, %3 : vector<128x128xf32>
    %c0_3 = arith.constant 0 : index
    %c0_4 = arith.constant 0 : index
    %5 = vector.load %arg5[%c0_3, %c0_4] : memref<128x128xbf16, #tpu.memory_space<vmem>>, vector<128x128xbf16>
    %6 = arith.extf %5 : vector<128x128xbf16> to vector<128x128xf32>
    %7 = arith.mulf %4, %6 : vector<128x128xf32>
    %c0_5 = arith.constant 0 : index
    %c0_6 = arith.constant 0 : index
    %8 = vector.load %arg4[%c0_5, %c0_6] : memref<128x128xbf16, #tpu.memory_space<vmem>>, vector<128x128xbf16>
    %9 = arith.extf %8 : vector<128x128xbf16> to vector<128x128xf32>
    %10 = arith.addf %7, %9 : vector<128x128xf32>
    %11 = arith.truncf %10 : vector<128x128xf32> to vector<128x128xbf16>
    %c0_7 = arith.constant 0 : index
    %c0_8 = arith.constant 0 : index
    %12 = vector.load %arg3[%c0_7, %c0_8] : memref<8x128xbf16, #tpu.memory_space<vmem>>, vector<8x128xbf16>
    %cst = arith.constant dense<0.000000e+00> : vector<8x128xf32>
    %13 = tpu.matmul %12, %11, %cst {dimension_numbers = #tpu.dot_dimension_numbers<[1], [1], [0], [0], [0, 0, 1, 0], [], []>} : vector<8x128xbf16>, vector<128x128xbf16>, vector<8x128xf32> -> vector<8x128xf32>
    %c0_9 = arith.constant 0 : index
    %c0_10 = arith.constant 0 : index
    %14 = vector.load %arg10[%c0_9, %c0_10] : memref<1x128xf32, #tpu.memory_space<vmem>>, vector<1x128xf32>
    %c0_11 = arith.constant 0 : index
    %c0_12 = arith.constant 0 : index
    %15 = vector.load %arg9[%c0_11, %c0_12] : memref<1x128xf32, #tpu.memory_space<vmem>>, vector<1x128xf32>
    %16 = arith.mulf %14, %15 : vector<1x128xf32>
    %c0_13 = arith.constant 0 : index
    %c0_14 = arith.constant 0 : index
    %17 = vector.load %arg8[%c0_13, %c0_14] : memref<1x128xf32, #tpu.memory_space<vmem>>, vector<1x128xf32>
    %18 = arith.addf %16, %17 : vector<1x128xf32>
    %19 = vector.broadcast %18 : vector<1x128xf32> to vector<8x128xf32>
    %20 = arith.addf %13, %19 : vector<8x128xf32>
    %c0_15 = arith.constant 0 : index
    %c0_16 = arith.constant 0 : index
    %21 = vector.load %arg11[%c0_15, %c0_16] : memref<8x128xf32, #tpu.memory_space<vmem>>, vector<8x128xf32>
    tpu.vector_store %arg11[%c0_15, %c0_16], %20 {strides = array<i32>} : memref<8x128xf32, #tpu.memory_space<vmem>>, vector<8x128xf32>,
    return
  }
  func.func @transform_0(%arg0: i32, %arg1: i32, %arg2: i32) -> (i32, i32) {
    %c0_i32 = arith.constant 0 : i32
    return %arg0, %arg2 : i32, i32
  }
  func.func @transform_1(%arg0: i32, %arg1: i32, %arg2: i32) -> (i32, i32) {
    %c0_i32 = arith.constant 0 : i32
    return %arg1, %arg2 : i32, i32
  }
  func.func @transform_2(%arg0: i32, %arg1: i32, %arg2: i32) -> (i32, i32) {
    %c0_i32 = arith.constant 0 : i32
    return %arg1, %arg2 : i32, i32
  }
  func.func @transform_3(%arg0: i32, %arg1: i32, %arg2: i32) -> (i32, i32) {
    %c0_i32 = arith.constant 0 : i32
    %c0_i32_0 = arith.constant 0 : i32
    return %arg1, %c0_i32 : i32, i32
  }
  func.func @transform_4(%arg0: i32, %arg1: i32, %arg2: i32) -> (i32, i32) {
    %c0_i32 = arith.constant 0 : i32
    %c0_i32_0 = arith.constant 0 : i32
    return %c0_i32, %arg2 : i32, i32
  }
  func.func @transform_5(%arg0: i32, %arg1: i32, %arg2: i32) -> (i32, i32) {
    %c0_i32 = arith.constant 0 : i32
    %c0_i32_0 = arith.constant 0 : i32
    return %c0_i32, %arg1 : i32, i32
  }
  func.func @transform_6(%arg0: i32, %arg1: i32, %arg2: i32) -> (i32, i32) {
    %c0_i32 = arith.constant 0 : i32
    %c0_i32_0 = arith.constant 0 : i32
    return %c0_i32, %arg1 : i32, i32
  }
  func.func @transform_7(%arg0: i32, %arg1: i32, %arg2: i32) -> (i32, i32) {
    %c0_i32 = arith.constant 0 : i32
    %c0_i32_0 = arith.constant 0 : i32
    return %c0_i32, %arg1 : i32, i32
  }
  func.func @transform_8(%arg0: i32, %arg1: i32, %arg2: i32) -> (i32, i32) {
    %c0_i32 = arith.constant 0 : i32
    return %arg0, %arg1 : i32, i32
  }
}

</mosaic_0001>

<bundles_post_ra>
// kernel: noisy_linear_forward.1
= control target key start
LH: loop header
LB: loop body
LE: loop exit
PB: predicated region body
PF: predicated region fallthrough
CT: control target
= control target key end

     0   :  { %v459_v2 = vmov 0   ;;  %s658_s0 = inlined_call_operand.vmem [shape: bf16[8,128], index: 0, kind: input, shape index: {}]   ;;  %s659_s1 = inlined_call_operand.vmem [shape: bf16[128,128], index: 1, kind: input, shape index: {}]   ;;  %s660_s2 = inlined_call_operand.vmem [shape: bf16[128,128], index: 2, kind: input, shape index: {}]   ;;  %s661_s3 = inlined_call_operand.vmem [shape: f32[128,1], index: 3, kind: input, shape index: {}]   ;;  %s662_s4 = inlined_call_operand.vmem [shape: f32[1,128], index: 4, kind: input, shape index: {}]   ;;  %s663_s5 = inlined_call_operand.vmem [shape: f32[1,128], index: 5, kind: input, shape index: {}]   ;;  %s664_s6 = inlined_call_operand.vmem [shape: f32[1,128], index: 6, kind: input, shape index: {}]   ;;  %s665_s7 = inlined_call_operand.vmem [shape: f32[1,128], index: 7, kind: input, shape index: {}]   ;;  %s666_s8 = inlined_call_operand.hbm [shape: f32[8,128], index: 8, kind: output, shape index: {}]  }
   0x1   :  { %v33_v0 = vld [vmem:[%s661_s3 + $0x10] sm:$0xff]  ;;  %v31_v1 = vld [vmem:[%s661_s3] sm:$0xff]  ;;  %434 = vset.pattern.permute.xlu1 %v459_v2  ;;  %433 = vset.pattern.permute.xlu0 %v459_v2  ;;  %v34_v3 = vld [vmem:[%s661_s3 + $0x18] sm:$0xff] }
   0x2   :  { %60 = vperm.xlu1 %434, %v33_v0   ;;  %50 = vperm.xlu0 %433, %v31_v1   ;;  %v32_v4 = vld [vmem:[%s661_s3 + $0x8] sm:$0xff]  ;;  %v35_v6 = vld [vmem:[%s661_s3 + $0x20] sm:$0xff] }
   0x3   :  { %v36_v5 = vld [vmem:[%s661_s3 + $0x28] sm:$0xff] }
   0x6   :  { %65 = vperm.xlu1 %434, %v34_v3   ;;  %55 = vperm.xlu0 %433, %v32_v4  }
   0x7   :  { %13 = vsyncpa [#allocation3], 0  ;;  %v38_v7 = vld [vmem:[%s661_s3 + $0x38] sm:$0xff]  ;;  %v37_v8 = vld [vmem:[%s661_s3 + $0x30] sm:$0xff]  ;;  %v460_v9 = vmov 0.0   ;;  %vm461_vm0 = vmmov 0  }
   0x8   :  { %409 = vmatprep.subr.bf16.mxu0 %v460_v9  ;;  %v40_v10 = vld [vmem:[%s661_s3 + $0x48] sm:$0xff]  ;;  %v39_v11 = vld [vmem:[%s661_s3 + $0x40] sm:$0xff]  ;;  %v42_v12 = vld [vmem:[%s661_s3 + $0x58] sm:$0xff]  ;;  %425 = vmatprep.mubr.msk.bf16.mxu0 %vm461_vm0, %v460_v9 }
   0x9   :  { %v41_v13 = vld [vmem:[%s661_s3 + $0x50] sm:$0xff]  ;;  %v44_v14 = vld [vmem:[%s661_s3 + $0x68] sm:$0xff]  ;;  %v43_v15 = vld [vmem:[%s661_s3 + $0x60] sm:$0xff] }
   0xa   :  { %75 = vperm.xlu1 %434, %v36_v5   ;;  %70 = vperm.xlu0 %433, %v35_v6   ;;  %v46_v16 = vld [vmem:[%s661_s3 + $0x78] sm:$0xff]  ;;  %v45_v17 = vld [vmem:[%s661_s3 + $0x70] sm:$0xff]  ;;  %v561_v18 = vld [vmem:[%s662_s4] ss:$0 sm:$0xff] }
   0xb   :  { %v323_v19 = vld [vmem:[%s660_s2] sm:$0xff]   ;;  %v386_v25 = vld [vmem:[%s660_s2 + $0x8] sm:$0xff]   ;;  %v387_v45 = vld [vmem:[%s660_s2 + $0x10] sm:$0xff]  }
   0xc   :  { %v324_v22 = vunpack.c.l.bf16 %v323_v19  ;;  %v355_v24 = vld [vmem:[%s659_s1] sm:$0xff]   ;;  %v325_v26 = vunpack.c.h.bf16 %v323_v19  ;;  %v328_v32 = vunpack.c.l.bf16 %v386_v25  ;;  %v393_v34 = vld [vmem:[%s659_s1 + $0x8] sm:$0xff]   ;;  %v329_v36 = vunpack.c.h.bf16 %v386_v25  ;;  %v394_v53 = vld [vmem:[%s659_s1 + $0x10] sm:$0xff]  }
   0xd   :  { %v356_v30 = vunpack.c.l.bf16 %v355_v24  ;;  %v357_v31 = vunpack.c.h.bf16 %v355_v24  ;;  %v360_v41 = vunpack.c.l.bf16 %v393_v34  ;;  %v361_v43 = vunpack.c.h.bf16 %v393_v34  ;;  %v388_v60 = vld [vmem:[%s660_s2 + $0x18] sm:$0xff]  }
   0xe   :  { %85 = vperm.xlu1 %434, %v38_v7   ;;  %80 = vperm.xlu0 %433, %v37_v8   ;;  %v333_v49 = vunpack.c.h.bf16 %v387_v45  ;;  %v332_v50 = vunpack.c.l.bf16 %v387_v45  ;;  %v365_v56 = vunpack.c.h.bf16 %v394_v53  ;;  %v364_v58 = vunpack.c.l.bf16 %v394_v53  ;;  %v395_v4 = vld [vmem:[%s659_s1 + $0x18] sm:$0xff]  }
   0xf   :  { %v337_v0 = vunpack.c.h.bf16 %v388_v60  ;;  %v336_v1 = vunpack.c.l.bf16 %v388_v60  ;;  %v369_v7 = vunpack.c.h.bf16 %v395_v4 }
  0x12   :  { %95 = vperm.xlu1 %434, %v40_v10   ;;  %90 = vperm.xlu0 %433, %v39_v11   ;;  %v368_v10 = vunpack.c.l.bf16 %v395_v4 }
  0x16   :  { %105 = vperm.xlu1 %434, %v42_v12   ;;  %100 = vperm.xlu0 %433, %v41_v13   ;;  %v389_v12 = vld [vmem:[%s660_s2 + $0x20] sm:$0xff]  }
  0x1a   :  { %115 = vperm.xlu1 %434, %v44_v14   ;;  %110 = vperm.xlu0 %433, %v43_v15  }
  0x1e   :  { %125 = vperm.xlu1 %434, %v46_v16   ;;  %120 = vperm.xlu0 %433, %v45_v17   ;;  %v341_v16 = vunpack.c.h.bf16 %v389_v12  ;;  %v340_v17 = vunpack.c.l.bf16 %v389_v12 }
  0x81   :  { %v61_v20 = vpop.permute.xlu1 %60  ;;  %v51_v21 = vpop.permute.xlu0 %50 }
  0x82   :  { %v134_v23 = vmul.f32 %v561_v18, %v51_v21  ;;  %v136_v35 = vmul.f32 %v561_v18, %v61_v20  ;;  %v396_v21 = vld [vmem:[%s659_s1 + $0x20] sm:$0xff]  }
  0x83   :  { %v373_v24 = vunpack.c.h.bf16 %v396_v21 }
  0x84   :  { %v182_v28 = vmul.f32 %v324_v22, %v134_v23  ;;  %v184_v42 = vmul.f32 %v328_v32, %v136_v35 }
  0x85   :  { %v56_v27 = vpop.permute.xlu0 %55  ;;  %v66_v33 = vpop.permute.xlu1 %65 }
  0x86   :  { %v135_v29 = vmul.f32 %v561_v18, %v56_v27  ;;  %v137_v37 = vmul.f32 %v561_v18, %v66_v33  ;;  %v230_v39 = vadd.f32 %v356_v30, %v182_v28  ;;  %v232_v51 = vadd.f32 %v360_v41, %v184_v42  ;;  %v390_v28 = vld [vmem:[%s660_s2 + $0x28] sm:$0xff]  }
  0x87   :  { %v345_v32 = vunpack.c.h.bf16 %v390_v28  ;;  %v344_v33 = vunpack.c.l.bf16 %v390_v28 }
  0x88   :  { %v183_v38 = vmul.f32 %v325_v26, %v135_v29  ;;  %v185_v44 = vmul.f32 %v329_v36, %v137_v37  ;;  %v372_v26 = vunpack.c.l.bf16 %v396_v21  ;;  %v397_v36 = vld [vmem:[%s659_s1 + $0x28] sm:$0xff]  }
  0x89   :  { %v76_v47 = vpop.permute.xlu1 %75  ;;  %v71_v48 = vpop.permute.xlu0 %70  ;;  %v376_v41 = vunpack.c.l.bf16 %v397_v36 }
  0x8a   :  { %v231_v40 = vadd.f32 %v357_v31, %v183_v38  ;;  %v233_v52 = vadd.f32 %v361_v43, %v185_v44  ;;  %v139_v54 = vmul.f32 %v561_v18, %v76_v47  ;;  %v138_v55 = vmul.f32 %v561_v18, %v71_v48  ;;  %v391_v43 = vld [vmem:[%s660_s2 + $0x30] sm:$0xff]  }
  0x8b   :  { %v349_v47 = vunpack.c.h.bf16 %v391_v43  ;;  %v348_v48 = vunpack.c.l.bf16 %v391_v43 }
  0x8c   :  { %v246_v46 = vpack.c.bf16 %v231_v40, %v230_v39  ;;  %v187_v57 = vmul.f32 %v333_v49, %v139_v54  ;;  %v186_v59 = vmul.f32 %v332_v50, %v138_v55  ;;  %v247_v61 = vpack.c.bf16 %v233_v52, %v232_v51  ;;  %v398_v51 = vld [vmem:[%s659_s1 + $0x30] sm:$0xff]  }
  0x8d   :  { %v86_v62 = vpop.permute.xlu1 %85  ;;  %v81_v63 = vpop.permute.xlu0 %80  ;;  %v377_v39 = vunpack.c.h.bf16 %v397_v36  ;;  %v381_v54 = vunpack.c.h.bf16 %v398_v51 }
  0x8e   :  { %410 = vmatpush3.bf16.xpose.msra.mxu0 %v246_v46  ;;  %v235_v2 = vadd.f32 %v365_v56, %v187_v57  ;;  %v234_v3 = vadd.f32 %v364_v58, %v186_v59  ;;  %v141_v5 = vmul.f32 %v561_v18, %v86_v62  ;;  %v140_v6 = vmul.f32 %v561_v18, %v81_v63  ;;  %v392_v58 = vld [vmem:[%s660_s2 + $0x38] sm:$0xff]  }
  0x8f   :  { %411 = vmatprep.subr.bf16.mxu0 %v460_v9  ;;  %v380_v56 = vunpack.c.l.bf16 %v398_v51  ;;  %v353_v62 = vunpack.c.h.bf16 %v392_v58  ;;  %v352_v63 = vunpack.c.l.bf16 %v392_v58 }
  0x90   :  { %v189_v8 = vmul.f32 %v337_v0, %v141_v5  ;;  %v188_v11 = vmul.f32 %v336_v1, %v140_v6  ;;  %v248_v13 = vpack.c.bf16 %v235_v2, %v234_v3  ;;  %v399_v2 = vld [vmem:[%s659_s1 + $0x38] sm:$0xff]  }
  0x91   :  { %v96_v14 = vpop.permute.xlu1 %95  ;;  %v91_v15 = vpop.permute.xlu0 %90  ;;  %v385_v5 = vunpack.c.h.bf16 %v399_v2 }
  0x92   :  { %v237_v19 = vadd.f32 %v369_v7, %v189_v8  ;;  %v236_v20 = vadd.f32 %v368_v10, %v188_v11  ;;  %v143_v22 = vmul.f32 %v561_v18, %v96_v14  ;;  %v142_v23 = vmul.f32 %v561_v18, %v91_v15  ;;  %v254_v14 = vld [vmem:[%s658_s0] sm:$0xf]  ;;  %s462_s0 = smov [#allocation2]  }
  0x93   :  { %v384_v7 = vunpack.c.l.bf16 %v399_v2  ;;  %v261_v15 = vlaneseq  ;;  %s313_s29 = sshll.u32 %s462_s0, 4  ;;  %s314_s29 = int_to_ptr.vmem [resolvable:$true] %s313_s29 }
  0x94   :  { %v191_v25 = vmul.f32 %v341_v16, %v143_v22  ;;  %v190_v27 = vmul.f32 %v340_v17, %v142_v23  ;;  %v249_v29 = vpack.c.bf16 %v237_v19, %v236_v20  ;;  %v256_v16 = vld [vmem:[%s664_s6] sm:$0x1]  ;;  %p440_p1 = scmp.lt.s32.totalorder %s314_s29, %s314_s29 }
  0x95   :  { %v106_v30 = vpop.permute.xlu1 %105  ;;  %v101_v31 = vpop.permute.xlu0 %100  ;;  %v258_v19 = vld [vmem:[%s663_s5] sm:$0x1] }
  0x96   :  { %412 = vmatpush3.bf16.xpose.msra.mxu0 %v247_v61  ;;  %v239_v34 = vadd.f32 %v373_v24, %v191_v25  ;;  %v238_v35 = vadd.f32 %v372_v26, %v190_v27  ;;  %v145_v37 = vmul.f32 %v561_v18, %v106_v30  ;;  %v144_v38 = vmul.f32 %v561_v18, %v101_v31 }
  0x97   :  { %413 = vmatprep.subr.bf16.mxu0 %v460_v9 }
  0x98   :  { %v193_v40 = vmul.f32 %v345_v32, %v145_v37  ;;  %v192_v42 = vmul.f32 %v344_v33, %v144_v38  ;;  %v250_v44 = vpack.c.bf16 %v239_v34, %v238_v35 }
  0x99   :  { %v116_v45 = vpop.permute.xlu1 %115  ;;  %v111_v46 = vpop.permute.xlu0 %110 }
  0x9a   :  { %v241_v49 = vadd.f32 %v377_v39, %v193_v40  ;;  %v240_v50 = vadd.f32 %v376_v41, %v192_v42  ;;  %v147_v52 = vmul.f32 %v561_v18, %v116_v45  ;;  %v146_v53 = vmul.f32 %v561_v18, %v111_v46 }
  0x9c   :  { %v195_v55 = vmul.f32 %v349_v47, %v147_v52  ;;  %v194_v57 = vmul.f32 %v348_v48, %v146_v53  ;;  %v251_v59 = vpack.c.bf16 %v241_v49, %v240_v50 }
  0x9d   :  { %v126_v60 = vpop.permute.xlu1 %125  ;;  %v121_v61 = vpop.permute.xlu0 %120 }
  0x9e   :  { %414 = vmatpush3.bf16.xpose.msra.mxu0 %v248_v13  ;;  %v243_v0 = vadd.f32 %v381_v54, %v195_v55  ;;  %v242_v1 = vadd.f32 %v380_v56, %v194_v57  ;;  %v149_v3 = vmul.f32 %v561_v18, %v126_v60  ;;  %v148_v4 = vmul.f32 %v561_v18, %v121_v61  ;;  %v255_v18 = vld [vmem:[%s665_s7] sm:$0x1]  ;;  %s435_s7 = scalar_lea.vmem %s314_s29, 128 }
  0x9f   :  { %415 = vmatprep.subr.bf16.mxu0 %v460_v9  ;;  %v257_v17 = vmul.f32 %v256_v16, %v255_v18  ;;  %p436_p0 = scmp.ne.s32.totalorder %s314_s29, %s435_s7  ;;  %p441_p2 = scmp.lt.s32.totalorder %s435_s7, %s435_s7 }
  0xa0   :  { %v197_v6 = vmul.f32 %v353_v62, %v149_v3  ;;  %v196_v8 = vmul.f32 %v352_v63, %v148_v4  ;;  %v252_v10 = vpack.c.bf16 %v243_v0, %v242_v1 }
  0xa1   :  { %v259_v20 = vadd.f32 %v258_v19, %v257_v17  ;;  %p442_p3 = por %p441_p2, %p440_p1 }
  0xa2   :  { %v245_v11 = vadd.f32 %v385_v5, %v197_v6  ;;  %v244_v12 = vadd.f32 %v384_v7, %v196_v8 }
  0xa3   :  { %p443_p4 = pnand %p442_p3, %p436_p0 }
  0xa4   :  { %v253_v13 = vpack.c.bf16 %v245_v11, %v244_v12 }
  0xa6   :  { %416 = vmatpush3.bf16.xpose.msra.mxu0 %v249_v29 }
  0xa7   :  { %417 = vmatprep.subr.bf16.mxu0 %v460_v9 }
  0xae   :  { %418 = vmatpush3.bf16.xpose.msra.mxu0 %v250_v44 }
  0xaf   :  { %419 = vmatprep.subr.bf16.mxu0 %v460_v9 }
  0xb6   :  { %420 = vmatpush3.bf16.xpose.msra.mxu0 %v251_v59 }
  0xb7   :  { %421 = vmatprep.subr.bf16.mxu0 %v460_v9 }
  0xbe   :  { %422 = vmatpush3.bf16.xpose.msra.mxu0 %v252_v10 }
  0xbf   :  { %423 = vmatprep.subr.bf16.mxu0 %v460_v9  ;;  %v262_v9 = vshrl.u32 %v261_v15, 7 }
  0xc1   :  { %v263_v21 = vsub.s32 0, %v262_v9 }
  0xc3   :  { %v264_v22 = vrot.slane %v259_v20, %v263_v21 }
  0xc6   :  { %424 = vmatpush3.bf16.xpose.msra.mxu0 %v253_v13 }
  0xcd   :  { %426 = vmatmul.mubr.bf16.vlgmr.msra.gmra.mrb[0].mxu0 %v254_v14 }
 0x1a0   :  { %v300_v23 = vpop.f32.mrb[0].mxu0 }
 0x1a1   :  { %v301_v24 = vadd.f32 %v300_v23, %v264_v22  ;;  %v427_v25 = vpop.f32.mrb[1].mxu0 }
 0x1a2   :  { %v303_v26 = vpop.f32.mrb[2].mxu0 }
 0x1a3   :  { %306 = vst [vmem:[#allocation2] sm:$0xff] %v301_v24  ;;  %v428_v27 = vpop.f32.mrb[3].mxu0 }
 0x1a4   :  { %446 = shalt.err (!%p443_p4)
}
 0x1a5   :  { %s447_s30 = scalar_lea.hbm %s666_s8, 128 }
 0x1a6   :  { %p448_p5 = scmp.ne.s32.totalorder %s666_s8, %s447_s30  ;;  %p451_p6 = scmp.lt.u32.totalorder %s447_s30, %s666_s8 }
 0x1a8   :  { %p453_p7 = pnand %p451_p6, %p448_p5 }
 0x1aa   :  { %456 = shalt.err (!%p453_p7)
}
 0x1ab   :  { %316 = dma.vmem_to_hbm [thread:$0]  %s314_s29, 128, %s666_s8, [#allocation3]  }
 0x1ac   :  { %457 = dma.done.wait [#allocation3], 128  }
 0x1ad   :  { %458 = vsyncadd [#allocation3], 4294967168 }
 0x1ae   :  { %320 = vsyncpa [#allocation3], 1 }

</bundles_post_ra>
